<compile_context>
chip_gen: v5e
topology: v5e:2x2
jax: 0.10.0
libtpu: 0.0.40
codegen_flags: <defaults>
</compile_context>

<pallas_src>
import functools
import math

import jax
import jax.numpy as jnp
from jax.experimental import pallas as pl
from jax.experimental.pallas import tpu as pltpu


def _token_embed_kernel(ids_ref, table_ref, out_ref, *, scale):
    # ids_ref:   VMEM (T, 1) int32     — token ids for this block
    # table_ref: VMEM (V, D)           — full embedding table, resident (1 buffer)
    # out_ref:   VMEM (T, D)           — dense output block for this step
    n_token = table_ref.shape[0]
    t = ids_ref.shape[0]

    ids = ids_ref[...]                                            # (T, 1)
    col = jax.lax.broadcasted_iota(jnp.int32, (t, n_token), 1)    # (T, V)

    # Fold the sqrt(D) scale into the one-hot when it is exact to do so (f32);
    # otherwise apply it on the f32 accumulator (free VPU op).
    fold_scale = table_ref.dtype == jnp.float32
    hot = jnp.asarray(scale if fold_scale else 1.0, dtype=table_ref.dtype)
    zero = jnp.asarray(0.0, dtype=table_ref.dtype)
    onehot = jnp.where(ids == col, hot, zero)                     # (T, V)

    acc = jnp.dot(onehot, table_ref[...],
                  preferred_element_type=jnp.float32)             # (T, D) f32
    if not fold_scale:
        acc = acc * scale
    out_ref[...] = acc.astype(out_ref.dtype)


def token_embedding(x, table, *, tokens_per_block=None, target_block_bytes=1 << 20):
    """x: (...,) int token ids; table: (n_token, D) -> (..., D) scaled embeddings."""
    n_token, D = table.shape
    scale = float(math.sqrt(D))
    itemsize = jnp.dtype(table.dtype).itemsize

    # Clamp ids (nn.Embedding would raise; jnp.take clamps) — avoids any OOB.
    ids = jnp.clip(x.reshape(-1).astype(jnp.int32), 0, n_token - 1)   # (n,)
    n = int(ids.shape[0])

    # Sublane multiple for dense stores: 8 (f32), 16 (bf16), 32 (int8/fp8).
    sub = max(8, 32 // itemsize)

    if tokens_per_block is None:
        t = target_block_bytes // (D * itemsize)
        t = max(sub, (t // sub) * sub)
        t = min(t, pl.cdiv(n, sub) * sub)      # don't exceed (rounded) token count
        tokens_per_block = t
    T = int(pl.cdiv(int(tokens_per_block), sub) * sub)

    n_blocks = pl.cdiv(n, T)
    n_pad = n_blocks * T
    if n_pad != n:
        # Pad only the ids (gather row 0); the ragged output block is masked
        # by Pallas on writeback — no post-kernel slice of the result.
        ids = jnp.concatenate([ids, jnp.zeros((n_pad - n,), jnp.int32)])
    ids2d = ids.reshape(n_pad, 1)

    # Explicit VMEM budget: resident table (1 buffer) + double-buffered id/out
    # blocks + one-hot intermediate + headroom; capped for v7x's 64 MiB VMEM.
    table_bytes = n_token * D * itemsize
    out_block_bytes = T * D * itemsize
    onehot_bytes = T * n_token * 4
    vmem_budget = table_bytes + 2 * (out_block_bytes + T * 4) + onehot_bytes + (4 << 20)
    vmem_budget = int(min(max(vmem_budget, 16 << 20), 48 << 20))

    out = pl.pallas_call(
        functools.partial(_token_embed_kernel, scale=scale),
        out_shape=jax.ShapeDtypeStruct((n, D), table.dtype),
        grid=(n_blocks,),
        in_specs=[
            pl.BlockSpec((T, 1), lambda i: (i, 0)),                 # ids block
            pl.BlockSpec(memory_space=pltpu.MemorySpace.VMEM),      # whole table, 1 buffer
        ],
        out_specs=pl.BlockSpec((T, D), lambda i: (i, 0)),
        compiler_params=pltpu.CompilerParams(
            dimension_semantics=("parallel",),     # independent blocks; 2x on v7x
            vmem_limit_bytes=vmem_budget,
        ),
    )(ids2d, table)

    return out.reshape(x.shape + (D,))


if __name__ == "__main__":
    # Module hyperparameters (synthetic, deterministic init — no checkpoint).
    n_token = 64
    dim_model = 128

    key = jax.random.PRNGKey(0)
    k_w, k_x = jax.random.split(key)

    # nn.Embedding weight: (n_token, dim_model), init ~ N(0, 1) like PyTorch default.
    embed_weight = jax.random.normal(k_w, (n_token, dim_model), dtype=jnp.float32)

    # Input token ids: (B, S)
    B, S = 2, 8
    x = jax.random.randint(k_x, (B, S), minval=0, maxval=n_token, dtype=jnp.int32)

    out = token_embedding(x, embed_weight)
    out = jax.block_until_ready(out)

    # Reference check (plain JAX gather + scale).
    ref = jnp.take(embed_weight, x, axis=0) * math.sqrt(dim_model)
    assert out.shape == (B, S, dim_model)
    assert out.dtype == jnp.float32
    assert jnp.allclose(out, ref, atol=1e-5, rtol=1e-5)

    print("KERNEL_OK")
</pallas_src>

<mosaic_0001>
module attributes {stable_mosaic.version = 11 : i64} {
  func.func @_token_embed_kernel(%arg0: i32, %arg1: memref<16x1xi32, #tpu.memory_space<vmem>>, %arg2: memref<64x128xf32, #tpu.memory_space<vmem>>, %arg3: memref<16x128xf32, #tpu.memory_space<vmem>>) attributes {dimension_semantics = [#tpu.dimension_semantics<parallel>], iteration_bounds = array<i64: 1>, scalar_prefetch = 0 : i64, scratch_operands = 0 : i64, tpu.core_type = #tpu.core_type<tc>, window_params = [{transform_indices = @transform_0, window_bounds = array<i64: 16, 1>}, {pipeline_mode = #tpu.pipeline_mode<synchronous>, transform_indices = @transform_1, window_bounds = array<i64: 64, 128>}, {transform_indices = @transform_2, window_bounds = array<i64: 16, 128>}]} {
    %c0 = arith.constant 0 : index
    %c0_0 = arith.constant 0 : index
    %0 = vector.load %arg1[%c0, %c0_0] : memref<16x1xi32, #tpu.memory_space<vmem>>, vector<16x1xi32>
    %1 = tpu.iota {dimensions = array<i32: 1>} : vector<16x64xi32>
    %2 = vector.broadcast %0 : vector<16x1xi32> to vector<16x64xi32>
    %3 = arith.cmpi eq, %2, %1 : vector<16x64xi32>
    %cst = arith.constant 11.3137083 : f32
    %cst_1 = arith.constant 0.000000e+00 : f32
    %4 = vector.broadcast %cst : f32 to vector<16x64xf32>
    %5 = vector.broadcast %cst_1 : f32 to vector<16x64xf32>
    %6 = arith.select %3, %4, %5 : vector<16x64xi1>, vector<16x64xf32>
    %c0_2 = arith.constant 0 : index
    %c0_3 = arith.constant 0 : index
    %7 = vector.load %arg2[%c0_2, %c0_3] : memref<64x128xf32, #tpu.memory_space<vmem>>, vector<64x128xf32>
    %cst_4 = arith.constant dense<0.000000e+00> : vector<16x128xf32>
    %8 = tpu.matmul %6, %7, %cst_4 {dimension_numbers = #tpu.dot_dimension_numbers<[1], [0], [0], [1], [0, 0, 1, 1], [], []>} : vector<16x64xf32>, vector<64x128xf32>, vector<16x128xf32> -> vector<16x128xf32>
    %c0_5 = arith.constant 0 : index
    %c0_6 = arith.constant 0 : index
    %9 = vector.load %arg3[%c0_5, %c0_6] : memref<16x128xf32, #tpu.memory_space<vmem>>, vector<16x128xf32>
    tpu.vector_store %arg3[%c0_5, %c0_6], %8 {strides = array<i32>} : memref<16x128xf32, #tpu.memory_space<vmem>>, vector<16x128xf32>,
    return
  }
  func.func @transform_0(%arg0: i32) -> (i32, i32) {
    %c0_i32 = arith.constant 0 : i32
    %c0_i32_0 = arith.constant 0 : i32
    return %arg0, %c0_i32 : i32, i32
  }
  func.func @transform_1(%arg0: i32) -> (i32, i32) {
    %c0_i32 = arith.constant 0 : i32
    %c0_i32_0 = arith.constant 0 : i32
    %c0_i32_1 = arith.constant 0 : i32
    return %c0_i32, %c0_i32_0 : i32, i32
  }
  func.func @transform_2(%arg0: i32) -> (i32, i32) {
    %c0_i32 = arith.constant 0 : i32
    %c0_i32_0 = arith.constant 0 : i32
    return %arg0, %c0_i32 : i32, i32
  }
}

</mosaic_0001>

<bundles_post_ra>
// kernel: tpu_custom_call.1
= control target key start
LH: loop header
LB: loop body
LE: loop exit
PB: predicated region body
PF: predicated region fallthrough
CT: control target
= control target key end

     0   :  { %7 = vsyncpa [#allocation3], 0  ;;  %s209_s0 = inlined_call_operand.vmem [shape: s32[16,1], index: 0, kind: input, shape index: {}]   ;;  %s210_s1 = inlined_call_operand.hbm [shape: f32[64,128], index: 1, kind: input, shape index: {}]   ;;  %s211_s2 = inlined_call_operand.hbm [shape: f32[16,128], index: 2, kind: output, shape index: {}]  }
   0x1   :  { %8 = vsyncpa [#allocation4], 0  ;;  %s15_s11 = sshll.u32 %s210_s1, 4  ;;  %s170_s12 = smov [#allocation2]   ;;  %s16_s11 = int_to_ptr.hbm [resolvable:$true] %s15_s11 }
   0x2   :  { %s17_s13 = sshll.u32 %s170_s12, 4  ;;  %s171_s14 = smov 128   ;;  %s18_s13 = int_to_ptr.vmem [resolvable:$true] %s17_s13 }
   0x3   :  { %s172_s15 = smov 8  }
   0x4   :  { %23 = dma.hbm_to_vmem [thread:$0]  %s16_s11, 1024, %s18_s13, [#allocation3], %s171_s14, %s171_s14, %s172_s15  }
   0x5   :  { %166 = dma.done.wait [#allocation3], 1024  }
   0x6   :  { %167 = vsyncadd [#allocation3], 4294966272  ;;  %v173_v0 = vmov 0   ;;  %v28_v1 = vld [vmem:[%s209_s0] sm:$0xff]  ;;  %v49_v2 = vld [vmem:[#allocation2 + $0x38] sm:$0xff]  ;;  %v30_v11 = vlaneseq  ;;  %vm50_vm0 = vcmask 523264  }
   0x7   :  { %117 = vset.pattern.permute.xlu0 %v173_v0  ;;  %65 = vmatpush.msra.mxu0 %v49_v2  ;;  %v48_v3 = vld [vmem:[#allocation2 + $0x30] sm:$0xff]  ;;  %v47_v4 = vld [vmem:[#allocation2 + $0x28] sm:$0xff]  ;;  %v46_v5 = vld [vmem:[#allocation2 + $0x20] sm:$0xff]  ;;  %v174_v14 = vmov 0.0   ;;  %s88_s22 = sshll.u32 %s211_s2, 4  ;;  %s89_s22 = int_to_ptr.hbm [resolvable:$true] %s88_s22 }
   0x8   :  { %33 = vperm.xlu0 %117, %v28_v1   ;;  %103 = vmatpush.msra.mxu1 %v49_v2  ;;  %v29_v6 = vld [vmem:[%s209_s0 + $0x8] sm:$0xff]  ;;  %v45_v7 = vld [vmem:[#allocation2 + $0x18] sm:$0xff]  ;;  %v44_v8 = vld [vmem:[#allocation2 + $0x10] sm:$0xff]  ;;  %v31_v12 = vand.u32 127, %v30_v11  ;;  %s175_s0 = smov [#allocation5]  }
   0x9   :  { %66 = vmatpush.msra.mxu0 %v48_v3  ;;  %v43_v9 = vld [vmem:[#allocation2 + $0x8] sm:$0xff]  ;;  %v42_v10 = vld [vmem:[#allocation2] sm:$0xff]  ;;  %s86_s19 = sshll.u32 %s175_s0, 4  ;;  %s87_s19 = int_to_ptr.vmem [resolvable:$true] %s86_s19 }
   0xa   :  { %104 = vmatpush.msra.mxu1 %v48_v3 }
   0xb   :  { %67 = vmatpush.msra.mxu0 %v47_v4 }
   0xc   :  { %105 = vmatpush.msra.mxu1 %v47_v4 }
   0xd   :  { %68 = vmatpush.msra.mxu0 %v46_v5 }
   0xe   :  { %106 = vmatpush.msra.mxu1 %v46_v5 }
   0xf   :  { %69 = vmatpush.msra.mxu0 %v45_v7 }
  0x10   :  { %36 = vperm.xlu0 %117, %v29_v6   ;;  %107 = vmatpush.msra.mxu1 %v45_v7 }
  0x11   :  { %70 = vmatpush.msra.mxu0 %v44_v8 }
  0x12   :  { %108 = vmatpush.msra.mxu1 %v44_v8 }
  0x13   :  { %71 = vmatpush.msra.mxu0 %v43_v9 }
  0x14   :  { %109 = vmatpush.msra.mxu1 %v43_v9 }
  0x15   :  { %72 = vmatpush.msra.mxu0 %v42_v10 }
  0x16   :  { %110 = vmatpush.msra.mxu1 %v42_v10 }
  0x7a   :  { %v34_v13 = vpop.permute.xlu0 %33 }
  0x7b   :  { %vm38_vm1 = vcmp.eq.s32.totalorder %v34_v13, %v31_v12 }
  0x7c   :  { %v40_v15 = vsel %vm38_vm1, 11.313708, %v174_v14 }
  0x7d   :  { %101 = vmatmul.msk.f32.vlgmr.msra.gmra.mxu0 %vm50_vm0, %v40_v15 }
  0x82   :  { %v37_v16 = vpop.permute.xlu0 %36 }
  0x83   :  { %vm39_vm2 = vcmp.eq.s32.totalorder %v37_v16, %v31_v12 }
  0x84   :  { %v41_v17 = vsel %vm39_vm2, 11.313708, %v174_v14 }
  0x85   :  { %102 = vmatmul.msk.f32.vlgmr.msra.gmra.mxu1 %vm50_vm0, %v41_v17 }
  0xfa   :  { %v74_v18 = vpop.f32.mrf.mxu0 }
  0xfb   :  { %80 = vst [vmem:[#allocation5] sm:$0xff] %v74_v18 }
 0x102   :  { %v77_v19 = vpop.f32.mrf.mxu1 }
 0x103   :  { %81 = vst [vmem:[#allocation5 + $0x8] sm:$0xff] %v77_v19 }
 0x104   :  { %94 = dma.vmem_to_hbm [thread:$0]  %s87_s19, 256, %s89_s22, [#allocation4], %s171_s14, %s171_s14, %s172_s15  }
 0x105   :  { %168 = dma.done.wait [#allocation4], 256  }
 0x106   :  { %169 = vsyncadd [#allocation4], 4294967040 }
 0x107   :  { %99 = vsyncpa [#allocation3], 1 }
 0x108   :  { %100 = vsyncpa [#allocation4], 1 }

</bundles_post_ra>
